<compile_context>
chip_gen: v5e
topology: v5e:2x2
jax: 0.10.0
libtpu: 0.0.40
codegen_flags: <defaults>
</compile_context>

<pallas_src>
import functools

import numpy as np
import jax
import jax.numpy as jnp
from jax import lax
from jax.experimental import pallas as pl
from jax.experimental.pallas import tpu as pltpu


def qmsan_kernel(x_ref, wf_ref, bo_ref, pa_ref, pc_ref, pr_ref, mask_ref,
                 out_ref, *, precision):
    """One grid step = one (T, E) row slab, T = block_b * S (whole batches)."""
    x = x_ref[...]                                        # (T, E) f32

    # AmplitudeEmbedding(normalize=True): per-token L2 normalization.
    # (No epsilon, matching the reference; an all-zero token is undefined in
    #  the original module as well.)
    inv_norm = lax.rsqrt(jnp.sum(x * x, axis=-1, keepdims=True))   # (T, 1)
    psi = x * inv_norm                                    # (T, E)

    dots = functools.partial(jnp.dot, preferred_element_type=jnp.float32,
                             precision=precision)

    # rho_flat[t, a*dk + c] = sum_d psi[t, a*dt + d] * psi[t, c*dt + d]
    # built via constant 0/1 expansion matrices: pure 2-D MXU matmuls with
    # dk^2 on the lane axis (no 5-D broadcast, no tiny batched matmuls).
    expand_a = dots(psi, pa_ref[...])                     # (T, dk*E)
    expand_c = dots(psi, pc_ref[...])                     # (T, dk*E)
    rho_flat = dots(expand_a * expand_c, pr_ref[...])     # (T, dk*dk)

    # scores[i,j] = trace(rho_i rho_j) = <rho_i, rho_j>_F (rho real symmetric),
    # computed for the whole slab then masked to (same batch) & (j <= i).
    scores = jnp.einsum('ik,jk->ij', rho_flat, rho_flat,
                        preferred_element_type=jnp.float32,
                        precision=precision)              # (T, T)
    scores = scores * mask_ref[...]                       # block-diag & tril

    # F.normalize(p=1, dim=-1, eps=1e-12). Reciprocal kept exact so the
    # DEFAULT / HIGH precision candidates can still meet the 1e-4 tolerance.
    denom = jnp.maximum(jnp.sum(jnp.abs(scores), axis=-1, keepdims=True), 1e-12)
    attn = scores * pl.reciprocal(denom, approx=False)    # (T, T)

    # Fused projection: out = attn @ (x @ (Wv_cat @ Wo^T)) + b_o.
    xw = dots(x, wf_ref[...])                             # (T, E)
    out = dots(attn, xw) + bo_ref[...]                    # (T, E)
    out_ref[...] = out.astype(out_ref.dtype)


def _pick_block_b(B, S):
    """Whole batches per grid step. Prefer fewer, fatter steps (per-step
    overhead ~0.35us). Rows per step are capped at 1024 so the (T,T) score
    slab stays <= 4 MiB f32 — comfortably inside the 32 MiB scoped-VMEM budget
    on every generation (v7x has only 64 MiB physical). Past ~2K tokens the
    grid naturally splits into >= 2 steps so v7x's two TensorCores get work."""
    rows_cap = 1024
    bb = max(1, min(B, rows_cap // max(S, 1)))
    # Block rows must divide B and be sublane-aligned (multiple of 8) unless
    # the block covers the full array.
    while bb > 1 and (B % bb or (bb * S) % 8):
        bb -= 1
    if B % bb or ((bb * S) % 8 and bb != B):
        bb = B                       # full-array block is always legal
    return bb


def multi_head_qmsan(x, wv_cat, wo_t, bo, *,
                     precision=lax.Precision.HIGHEST, block_b=None):
    B, S, E = x.shape
    n = int(np.log2(E))
    d_kept = 2 ** (n // 2)           # wires[: n // 2] are kept
    d_traced = E // d_kept           # remaining wires are traced out
    if block_b is None:
        block_b = _pick_block_b(B, S)
    rows = block_b * S               # tokens per grid step
    grid = (B // block_b,)

    # Offline weight fusion: (attn @ x @ Wv_cat) @ Wo^T == attn @ (x @ W_fused).
    w_fused = jnp.dot(wv_cat, wo_t, precision=lax.Precision.HIGHEST)   # (E, E)

    # Constant 0/1 expansion / reduction matrices for rho_flat.
    L = d_kept * d_kept * d_traced
    p_a = np.zeros((E, L), np.float32)
    p_c = np.zeros((E, L), np.float32)
    p_r = np.zeros((L, d_kept * d_kept), np.float32)
    for a in range(d_kept):
        for c in range(d_kept):
            for d in range(d_traced):
                col = (a * d_kept + c) * d_traced + d
                p_a[a * d_traced + d, col] = 1.0
                p_c[c * d_traced + d, col] = 1.0
                p_r[col, a * d_kept + c] = 1.0

    # Block-diagonal (per-batch) lower-triangular mask for one row slab; the
    # same mask applies to every grid step since each slab holds whole batches.
    t_idx = np.arange(rows)
    same_batch = (t_idx[:, None] // S) == (t_idx[None, :] // S)
    lower_tri = t_idx[None, :] <= t_idx[:, None]
    mask = (same_batch & lower_tri).astype(np.float32)    # (rows, rows)

    x2 = x.reshape(B * S, E)
    bo2 = jnp.asarray(bo, jnp.float32).reshape(1, E)

    kern = functools.partial(qmsan_kernel, precision=precision)
    out2 = pl.pallas_call(
        kern,
        out_shape=jax.ShapeDtypeStruct((B * S, E), jnp.float32),
        grid=grid,
        in_specs=[
            pl.BlockSpec((rows, E), lambda b: (b, 0)),             # x row slab
            pl.BlockSpec(memory_space=pltpu.MemorySpace.VMEM),     # W_fused
            pl.BlockSpec(memory_space=pltpu.MemorySpace.VMEM),     # b_o
            pl.BlockSpec(memory_space=pltpu.MemorySpace.VMEM),     # P_A
            pl.BlockSpec(memory_space=pltpu.MemorySpace.VMEM),     # P_C
            pl.BlockSpec(memory_space=pltpu.MemorySpace.VMEM),     # P_R
            pl.BlockSpec(memory_space=pltpu.MemorySpace.VMEM),     # mask
        ],
        out_specs=pl.BlockSpec((rows, E), lambda b: (b, 0)),
        compiler_params=pltpu.CompilerParams(
            dimension_semantics=("parallel",),
            vmem_limit_bytes=32 * 1024 * 1024),
    )(x2, w_fused, bo2, jnp.asarray(p_a), jnp.asarray(p_c), jnp.asarray(p_r),
      jnp.asarray(mask))
    return out2.reshape(B, S, E)


def reference(x, wv_cat, wo_t, bo):
    """Pure-JAX ground truth mirroring the PyTorch forward semantics
    (unfused weights, per-batch (S,S) attention)."""
    B, S, E = x.shape
    n = int(np.log2(E))
    d_kept = 2 ** (n // 2)
    d_traced = E // d_kept
    hi = lax.Precision.HIGHEST
    psi = x / jnp.linalg.norm(x, axis=-1, keepdims=True)
    M = psi.reshape(B, S, d_kept, d_traced)
    rho = jnp.einsum('bsij,bskj->bsik', M, M, precision=hi)      # (B,S,dk,dk)
    scores = jnp.einsum('bsik,btki->bst', rho, rho, precision=hi)
    mask = jnp.tril(jnp.ones((S, S), dtype=bool))
    scores = jnp.where(mask[None], scores, 0.0)
    denom = jnp.maximum(jnp.sum(jnp.abs(scores), -1, keepdims=True), 1e-12)
    attn = scores / denom
    V = jnp.einsum('bse,ef->bsf', x, wv_cat, precision=hi)
    out = jnp.einsum('bst,btf->bsf', attn, V, precision=hi)
    return jnp.einsum('bsf,fe->bse', out, wo_t, precision=hi) + bo.reshape(1, 1, E)


if __name__ == "__main__":
    B, S, E, n_heads = 2, 8, 16, 4          # E = 2^4 -> 2 kept wires, d_kept = 4
    head_size = E // n_heads

    key = jax.random.PRNGKey(0)
    kx, kv, kw, kb = jax.random.split(key, 4)

    x = jax.random.normal(kx, (B, S, E), dtype=jnp.float32)

    # Deterministic synthetic parameters (shapes match the nn.Linear definitions).
    W_heads = jax.random.normal(kv, (n_heads, head_size, E), jnp.float32) / np.sqrt(E)
    wv_cat = jnp.concatenate([W_heads[h].T for h in range(n_heads)], axis=1)  # (E, E)
    W_o = jax.random.normal(kw, (E, E), jnp.float32) / np.sqrt(E)
    b_o = 0.01 * jax.random.normal(kb, (E,), jnp.float32)
    wo_t = W_o.T                      # (E, E)
    bo = b_o.reshape(1, E)

    ref = np.asarray(reference(x, wv_cat, wo_t, bo))

    # MXU precision auto-selection: cheapest first (single-pass bf16), then
    # bf16_3x, then full-f32 emulation as a guaranteed fallback. The catch is
    # narrowed to the errors we expect (tolerance miss / Mosaic lowering).
    out = None
    last_err = None
    candidates = (lax.Precision.DEFAULT, lax.Precision.HIGH, lax.Precision.HIGHEST)
    for prec in candidates:
        try:
            cand = jax.block_until_ready(
                multi_head_qmsan(x, wv_cat, wo_t, bo, precision=prec))
            np.testing.assert_allclose(np.asarray(cand), ref, rtol=1e-4, atol=1e-4)
            out = cand
            break
        except (AssertionError, NotImplementedError, pltpu.LoweringException) as e:
            last_err = e
            continue
    if out is None:
        raise last_err
    print("KERNEL_OK")
</pallas_src>

<mosaic_0001>
module attributes {stable_mosaic.version = 11 : i64} {
  func.func @qmsan_kernel(%arg0: i32, %arg1: memref<16x16xf32, #tpu.memory_space<vmem>>, %arg2: memref<16x16xf32, #tpu.memory_space<vmem>>, %arg3: memref<1x16xf32, #tpu.memory_space<vmem>>, %arg4: memref<16x64xf32, #tpu.memory_space<vmem>>, %arg5: memref<16x64xf32, #tpu.memory_space<vmem>>, %arg6: memref<64x16xf32, #tpu.memory_space<vmem>>, %arg7: memref<16x16xf32, #tpu.memory_space<vmem>>, %arg8: memref<16x16xf32, #tpu.memory_space<vmem>>) attributes {dimension_semantics = [#tpu.dimension_semantics<parallel>], iteration_bounds = array<i64: 1>, scalar_prefetch = 0 : i64, scratch_operands = 0 : i64, tpu.core_type = #tpu.core_type<tc>, window_params = [{transform_indices = @transform_0, window_bounds = array<i64: 16, 16>}, {pipeline_mode = #tpu.pipeline_mode<synchronous>, transform_indices = @transform_1, window_bounds = array<i64: 16, 16>}, {pipeline_mode = #tpu.pipeline_mode<synchronous>, transform_indices = @transform_2, window_bounds = array<i64: 1, 16>}, {pipeline_mode = #tpu.pipeline_mode<synchronous>, transform_indices = @transform_3, window_bounds = array<i64: 16, 64>}, {pipeline_mode = #tpu.pipeline_mode<synchronous>, transform_indices = @transform_4, window_bounds = array<i64: 16, 64>}, {pipeline_mode = #tpu.pipeline_mode<synchronous>, transform_indices = @transform_5, window_bounds = array<i64: 64, 16>}, {pipeline_mode = #tpu.pipeline_mode<synchronous>, transform_indices = @transform_6, window_bounds = array<i64: 16, 16>}, {transform_indices = @transform_7, window_bounds = array<i64: 16, 16>}]} {
    %c0 = arith.constant 0 : index
    %c0_0 = arith.constant 0 : index
    %0 = vector.load %arg1[%c0, %c0_0] : memref<16x16xf32, #tpu.memory_space<vmem>>, vector<16x16xf32>
    %1 = arith.mulf %0, %0 : vector<16x16xf32>
    %cst = arith.constant dense<0.000000e+00> : vector<16xf32>
    %2 = vector.multi_reduction <add>, %1, %cst [1] : vector<16x16xf32> to vector<16xf32>
    %3 = vector.shape_cast %2 : vector<16xf32> to vector<16x1xf32>
    %4 = math.rsqrt %3 : vector<16x1xf32>
    %5 = vector.broadcast %4 : vector<16x1xf32> to vector<16x16xf32>
    %6 = arith.mulf %0, %5 : vector<16x16xf32>
    %c0_1 = arith.constant 0 : index
    %c0_2 = arith.constant 0 : index
    %7 = vector.load %arg4[%c0_1, %c0_2] : memref<16x64xf32, #tpu.memory_space<vmem>>, vector<16x64xf32>
    %cst_3 = arith.constant dense<0.000000e+00> : vector<16x64xf32>
    %8 = tpu.matmul %6, %7, %cst_3 {dimension_numbers = #tpu.dot_dimension_numbers<[1], [0], [0], [1], [0, 0, 1, 1], [], []>} : vector<16x16xf32>, vector<16x64xf32>, vector<16x64xf32> -> vector<16x64xf32>
    %c0_4 = arith.constant 0 : index
    %c0_5 = arith.constant 0 : index
    %9 = vector.load %arg5[%c0_4, %c0_5] : memref<16x64xf32, #tpu.memory_space<vmem>>, vector<16x64xf32>
    %cst_6 = arith.constant dense<0.000000e+00> : vector<16x64xf32>
    %10 = tpu.matmul %6, %9, %cst_6 {dimension_numbers = #tpu.dot_dimension_numbers<[1], [0], [0], [1], [0, 0, 1, 1], [], []>} : vector<16x16xf32>, vector<16x64xf32>, vector<16x64xf32> -> vector<16x64xf32>
    %11 = arith.mulf %8, %10 : vector<16x64xf32>
    %c0_7 = arith.constant 0 : index
    %c0_8 = arith.constant 0 : index
    %12 = vector.load %arg6[%c0_7, %c0_8] : memref<64x16xf32, #tpu.memory_space<vmem>>, vector<64x16xf32>
    %cst_9 = arith.constant dense<0.000000e+00> : vector<16x16xf32>
    %13 = tpu.matmul %11, %12, %cst_9 {dimension_numbers = #tpu.dot_dimension_numbers<[1], [0], [0], [1], [0, 0, 1, 1], [], []>} : vector<16x64xf32>, vector<64x16xf32>, vector<16x16xf32> -> vector<16x16xf32>
    "tpu.trace_start"() <{level = 10 : i32, message = "ik,jk->ij"}> : () -> ()
    %cst_10 = arith.constant dense<0.000000e+00> : vector<16x16xf32>
    %14 = tpu.matmul %13, %13, %cst_10 {dimension_numbers = #tpu.dot_dimension_numbers<[1], [1], [0], [0], [0, 0, 1, 0], [], []>} : vector<16x16xf32>, vector<16x16xf32>, vector<16x16xf32> -> vector<16x16xf32>
    "tpu.trace_stop"() : () -> ()
    %c0_11 = arith.constant 0 : index
    %c0_12 = arith.constant 0 : index
    %15 = vector.load %arg7[%c0_11, %c0_12] : memref<16x16xf32, #tpu.memory_space<vmem>>, vector<16x16xf32>
    %16 = arith.mulf %14, %15 : vector<16x16xf32>
    %17 = math.absf %16 : vector<16x16xf32>
    %cst_13 = arith.constant dense<0.000000e+00> : vector<16xf32>
    %18 = vector.multi_reduction <add>, %17, %cst_13 [1] : vector<16x16xf32> to vector<16xf32>
    %19 = vector.shape_cast %18 : vector<16xf32> to vector<16x1xf32>
    %cst_14 = arith.constant 9.99999996E-13 : f32
    %20 = vector.broadcast %cst_14 : f32 to vector<16x1xf32>
    %21 = arith.maximumf %19, %20 : vector<16x1xf32>
    %22 = tpu.reciprocal %21 : vector<16x1xf32> -> vector<16x1xf32>
    %23 = vector.broadcast %22 : vector<16x1xf32> to vector<16x16xf32>
    %24 = arith.mulf %16, %23 : vector<16x16xf32>
    %c0_15 = arith.constant 0 : index
    %c0_16 = arith.constant 0 : index
    %25 = vector.load %arg2[%c0_15, %c0_16] : memref<16x16xf32, #tpu.memory_space<vmem>>, vector<16x16xf32>
    %cst_17 = arith.constant dense<0.000000e+00> : vector<16x16xf32>
    %26 = tpu.matmul %0, %25, %cst_17 {dimension_numbers = #tpu.dot_dimension_numbers<[1], [0], [0], [1], [0, 0, 1, 1], [], []>} : vector<16x16xf32>, vector<16x16xf32>, vector<16x16xf32> -> vector<16x16xf32>
    %cst_18 = arith.constant dense<0.000000e+00> : vector<16x16xf32>
    %27 = tpu.matmul %24, %26, %cst_18 {dimension_numbers = #tpu.dot_dimension_numbers<[1], [0], [0], [1], [0, 0, 1, 1], [], []>} : vector<16x16xf32>, vector<16x16xf32>, vector<16x16xf32> -> vector<16x16xf32>
    %c0_19 = arith.constant 0 : index
    %c0_20 = arith.constant 0 : index
    %28 = vector.load %arg3[%c0_19, %c0_20] : memref<1x16xf32, #tpu.memory_space<vmem>>, vector<1x16xf32>
    %29 = vector.broadcast %28 : vector<1x16xf32> to vector<16x16xf32>
    %30 = arith.addf %27, %29 : vector<16x16xf32>
    %c0_21 = arith.constant 0 : index
    %c0_22 = arith.constant 0 : index
    %31 = vector.load %arg8[%c0_21, %c0_22] : memref<16x16xf32, #tpu.memory_space<vmem>>, vector<16x16xf32>
    tpu.vector_store %arg8[%c0_21, %c0_22], %30 {strides = array<i32>} : memref<16x16xf32, #tpu.memory_space<vmem>>, vector<16x16xf32>,
    return
  }
  func.func @transform_0(%arg0: i32) -> (i32, i32) {
    %c0_i32 = arith.constant 0 : i32
    %c0_i32_0 = arith.constant 0 : i32
    return %arg0, %c0_i32 : i32, i32
  }
  func.func @transform_1(%arg0: i32) -> (i32, i32) {
    %c0_i32 = arith.constant 0 : i32
    %c0_i32_0 = arith.constant 0 : i32
    %c0_i32_1 = arith.constant 0 : i32
    return %c0_i32, %c0_i32_0 : i32, i32
  }
  func.func @transform_2(%arg0: i32) -> (i32, i32) {
    %c0_i32 = arith.constant 0 : i32
    %c0_i32_0 = arith.constant 0 : i32
    %c0_i32_1 = arith.constant 0 : i32
    return %c0_i32, %c0_i32_0 : i32, i32
  }
  func.func @transform_3(%arg0: i32) -> (i32, i32) {
    %c0_i32 = arith.constant 0 : i32
    %c0_i32_0 = arith.constant 0 : i32
    %c0_i32_1 = arith.constant 0 : i32
    return %c0_i32, %c0_i32_0 : i32, i32
  }
  func.func @transform_4(%arg0: i32) -> (i32, i32) {
    %c0_i32 = arith.constant 0 : i32
    %c0_i32_0 = arith.constant 0 : i32
    %c0_i32_1 = arith.constant 0 : i32
    return %c0_i32, %c0_i32_0 : i32, i32
  }
  func.func @transform_5(%arg0: i32) -> (i32, i32) {
    %c0_i32 = arith.constant 0 : i32
    %c0_i32_0 = arith.constant 0 : i32
    %c0_i32_1 = arith.constant 0 : i32
    return %c0_i32, %c0_i32_0 : i32, i32
  }
  func.func @transform_6(%arg0: i32) -> (i32, i32) {
    %c0_i32 = arith.constant 0 : i32
    %c0_i32_0 = arith.constant 0 : i32
    %c0_i32_1 = arith.constant 0 : i32
    return %c0_i32, %c0_i32_0 : i32, i32
  }
  func.func @transform_7(%arg0: i32) -> (i32, i32) {
    %c0_i32 = arith.constant 0 : i32
    %c0_i32_0 = arith.constant 0 : i32
    return %arg0, %c0_i32 : i32, i32
  }
}

</mosaic_0001>

<bundles_post_ra>
// kernel: tpu_custom_call.1
= control target key start
LH: loop header
LB: loop body
LE: loop exit
PB: predicated region body
PF: predicated region fallthrough
CT: control target
= control target key end

     0   :  { %vm31_vm0 = vcmask 130048   ;;  %s500_s0 = inlined_call_operand.vmem [shape: f32[16,16], index: 0, kind: input, shape index: {}]   ;;  %s501_s1 = inlined_call_operand.vmem [shape: f32[16,16], index: 1, kind: input, shape index: {}]   ;;  %s502_s2 = inlined_call_operand.vmem [shape: f32[1,16], index: 2, kind: input, shape index: {}]   ;;  %s503_s3 = inlined_call_operand.vmem [shape: f32[16,64], index: 3, kind: input, shape index: {}]   ;;  %s504_s4 = inlined_call_operand.vmem [shape: f32[16,64], index: 4, kind: input, shape index: {}]   ;;  %s505_s5 = inlined_call_operand.vmem [shape: f32[64,16], index: 5, kind: input, shape index: {}]   ;;  %s506_s6 = inlined_call_operand.vmem [shape: f32[16,16], index: 6, kind: input, shape index: {}]   ;;  %s507_s7 = inlined_call_operand.hbm [shape: f32[16,16], index: 7, kind: output, shape index: {}]  }
   0x1   :  { %v413_v0 = vld [vmem:[%s500_s0] sm:$0xff] }
   0x2   :  { %v29_v1 = vmul.f32 %v413_v0, %v413_v0 }
   0x3   :  { %12 = vsyncpa [#allocation3], 0  ;;  %v420_v2 = vld [vmem:[%s500_s0 + $0x8] sm:$0xff]  ;;  %v60_v8 = vld [vmem:[%s503_s3] sm:$0xff]  ;;  %vm126_vm7 = vcmask 523264   ;;  %s367_s9 = smov [#allocation2]  }
   0x4   :  { %v32_v3 = vsel %vm31_vm0, %v29_v1, 0.0  ;;  %v30_v4 = vmul.f32 %v420_v2, %v420_v2  ;;  %v61_v6 = vld [vmem:[%s503_s3 + $0x8] sm:$0xff]  ;;  %v91_v9 = vld [vmem:[%s504_s4] sm:$0xff]  ;;  %v125_v10 = vld [vmem:[%s505_s5 + $0x38] sm:$0xff]  ;;  %s299_s10 = sshll.u32 %s367_s9, 4  ;;  %s301_s13 = sshll.u32 %s507_s7, 4  ;;  %s300_s10 = int_to_ptr.vmem [resolvable:$true] %s299_s10  ;;  %s302_s13 = int_to_ptr.hbm [resolvable:$true] %s301_s13 }
   0x5   :  { %33 = vadd.xlane.f32.xlu0 %v32_v3  ;;  %v92_v7 = vld [vmem:[%s504_s4 + $0x8] sm:$0xff]  ;;  %82 = vmatpush.msra.mxu0 %v61_v6  ;;  %v124_v11 = vld [vmem:[%s505_s5 + $0x30] sm:$0xff]  ;;  %v122_v14 = vld [vmem:[%s505_s5 + $0x20] sm:$0xff]  ;;  %s368_s14 = smov 128   ;;  %s369_s15 = smov 8  }
   0x6   :  { %v35_v5 = vsel %vm31_vm0, %v30_v4, 0.0  ;;  %107 = vmatpush.msra.mxu1 %v92_v7  ;;  %327 = vmatpush.msra.mxu3 %v61_v6  ;;  %v123_v12 = vld [vmem:[%s505_s5 + $0x28] sm:$0xff]  ;;  %v121_v15 = vld [vmem:[%s505_s5 + $0x18] sm:$0xff]  ;;  %v120_v16 = vld [vmem:[%s505_s5 + $0x10] sm:$0xff] }
   0x7   :  { %83 = vmatpush.msra.mxu0 %v60_v8  ;;  %141 = vmatpush.msra.mxu2 %v125_v10  ;;  %v119_v34 = vld [vmem:[%s505_s5 + $0x8] sm:$0xff]  ;;  %v118_v35 = vld [vmem:[%s505_s5] sm:$0xff] }
   0x8   :  { %108 = vmatpush.msra.mxu1 %v91_v9  ;;  %328 = vmatpush.msra.mxu3 %v60_v8  ;;  %v230_v42 = vld [vmem:[%s501_s1 + $0x8] sm:$0xff]  ;;  %v229_v43 = vld [vmem:[%s501_s1] sm:$0xff] }
   0x9   :  { %142 = vmatpush.msra.mxu2 %v124_v11  ;;  %251 = vmatpush.msrb.mxu0 %v230_v42  ;;  %v185_v48 = vld [vmem:[%s506_s6] sm:$0xff]  ;;  %v186_v53 = vld [vmem:[%s506_s6 + $0x8] sm:$0xff] }
   0xb   :  { %143 = vmatpush.msra.mxu2 %v123_v12  ;;  %252 = vmatpush.msrb.mxu0 %v229_v43 }
   0xd   :  { %36 = vadd.xlane.f32.xlu0 %v35_v5  ;;  %144 = vmatpush.msra.mxu2 %v122_v14 }
   0xf   :  { %145 = vmatpush.msra.mxu2 %v121_v15 }
  0x11   :  { %146 = vmatpush.msra.mxu2 %v120_v16 }
  0x13   :  { %147 = vmatpush.msra.mxu2 %v119_v34 }
  0x15   :  { %148 = vmatpush.msra.mxu2 %v118_v35 }
  0x78   :  { %v34_v13 = vpop.xlane.xlu0 %33 }
  0x79   :  { %333 = vrsqrt.f32 %v34_v13  ;;  %vm44_vm2 = vweird.f32 %v34_v13 }
  0x7f   :  { %v334_v17 = vpop.eup %333 }
  0x80   :  { %v39_v18 = vmul.f32 %v334_v17, %v34_v13  ;;  %v37_v19 = vpop.xlane.xlu0 %36  ;;  %vm45_vm1 = vweird.f32 %v334_v17 }
  0x81   :  { %335 = vrsqrt.f32 %v37_v19  ;;  %vm46_vm3 = vmor %vm44_vm2, %vm45_vm1  ;;  %vm54_vm5 = vweird.f32 %v37_v19 }
  0x82   :  { %v40_v20 = vmul.f32 %v334_v17, %v39_v18 }
  0x84   :  { %v41_v21 = vmul.f32 0.5, %v40_v20  ;;  %v332_v20 = vld [vmem:[%s502_s2] ss:$0 sm:$0xff] }
  0x86   :  { %v42_v22 = vsub.f32 1.5, %v41_v21 }
  0x87   :  { %v336_v23 = vpop.eup %335 }
  0x88   :  { %v43_v24 = vmul.f32 %v334_v17, %v42_v22  ;;  %v49_v25 = vmul.f32 %v336_v23, %v37_v19  ;;  %vm55_vm4 = vweird.f32 %v336_v23 }
  0x89   :  { %vm56_vm6 = vmor %vm54_vm5, %vm55_vm4 }
  0x8a   :  { %v50_v26 = vmul.f32 %v336_v23, %v49_v25  ;;  %v47_v27 = vsel %vm46_vm3, %v334_v17, %v43_v24 }
  0x8b   :  { %v58_v28 = vmul.f32 %v47_v27, %v413_v0 }
  0x8c   :  { %v51_v29 = vmul.f32 0.5, %v50_v26 }
  0x8d   :  { %313 = vmatmul.msk.f32.vlgmr.msra.gmra.mxu0 %vm31_vm0, %v58_v28  ;;  %315 = vmatmul.msk.f32.vlgmr.msra.gmra.mxu1 %vm31_vm0, %v58_v28 }
  0x8e   :  { %v52_v30 = vsub.f32 1.5, %v51_v29 }
  0x90   :  { %v53_v31 = vmul.f32 %v336_v23, %v52_v30 }
  0x92   :  { %v57_v32 = vsel %vm56_vm6, %v336_v23, %v53_v31 }
  0x93   :  { %v59_v33 = vmul.f32 %v57_v32, %v420_v2 }
  0x95   :  { %314 = vmatmul.msk.f32.vlgmr.msra.gmra.mxu3 %vm31_vm0, %v59_v33  ;;  %316 = vmatmul.msk.f32.gmra.mxu1 %vm31_vm0, %v59_v33 }
  0x96   :  { %323 = vmatmul.msk.f32.vlgmr.msrb.gmra.mxu0 %vm31_vm0, %v413_v0 }
  0x9e   :  { %324 = vmatmul.msk.f32.gmra.mxu0 %vm31_vm0, %v420_v2 }
 0x10a   :  { %v85_v36 = vpop.f32.mrf.mxu0  ;;  %v110_v37 = vpop.f32.mrf.mxu1 }
 0x10b   :  { %v116_v38 = vmul.f32 %v110_v37, %v85_v36 }
 0x10d   :  { %317 = vmatmul.msk.f32.vlgmr.msra.gmra.mxu2 %vm126_vm7, %v116_v38 }
 0x112   :  { %v113_v39 = vpop.f32.mrf.mxu1 }
 0x113   :  { %v254_v46 = vpop.f32.mrf.mxu0 }
 0x118   :  { %v88_v40 = vpop.f32.mrf.mxu3 }
 0x119   :  { %v117_v41 = vmul.f32 %v113_v39, %v88_v40 }
 0x11b   :  { %318 = vmatmul.msk.f32.gmra.mxu2 %vm126_vm7, %v117_v41  ;;  %v257_v47 = vpop.f32.mrf.mxu0 }
 0x11c   :  { %284 = vmatpush.msrb.mxu1 %v257_v47 }
 0x11e   :  { %285 = vmatpush.msrb.mxu1 %v254_v46 }
 0x190   :  { %v150_v44 = vpop.f32.mrf.mxu2 }
 0x19e   :  { %v153_v45 = vpop.f32.mrf.mxu2 }
 0x19f   :  { %319 = vmatpush.xpose.msk.msrb.mxu3 %vm31_vm0, %v153_v45 }
 0x1a3   :  { %320 = vmatpush.xpose.msk.msrb.mxu3 %vm31_vm0, %v150_v44 }
 0x1a6   :  { %321 = vmatmul.msk.f32.vlgmr.msrb.gmra.mxu3 %vm31_vm0, %v150_v44 }
 0x1ae   :  { %322 = vmatmul.msk.f32.gmra.mxu3 %vm31_vm0, %v153_v45 }
 0x229   :  { %v179_v49 = vpop.f32.mrf.mxu3 }
 0x22a   :  { %v187_v50 = vmul.f32 %v185_v48, %v179_v49 }
 0x22c   :  { %v189_v51 = vand.u32 2147483647, %v187_v50 }
 0x22e   :  { %v191_v52 = vsel %vm31_vm0, %v189_v51, 0.0 }
 0x22f   :  { %192 = vadd.xlane.f32.xlu1 %v191_v52 }
 0x231   :  { %v182_v54 = vpop.f32.mrf.mxu3 }
 0x232   :  { %v188_v55 = vmul.f32 %v186_v53, %v182_v54 }
 0x234   :  { %v190_v56 = vand.u32 2147483647, %v188_v55 }
 0x236   :  { %v194_v57 = vsel %vm31_vm0, %v190_v56, 0.0 }
 0x237   :  { %195 = vadd.xlane.f32.xlu1 %v194_v57 }
 0x2a2   :  { %v193_v58 = vpop.xlane.xlu1 %192 }
 0x2a3   :  { %v197_v59 = vmax.f32 %v193_v58, 1e-12 }
 0x2a5   :  { %337 = vrcp.f32 %v197_v59  ;;  %v210_v1 = vand.u32 2147483648, %v197_v59  ;;  %v208_v3 = vand.u32 2147483647, %v197_v59  ;;  %vm204_vm9 = vweird.f32 %v197_v59 }
 0x2a7   :  { %v211_v6 = vor.u32 1.1754944e-38, %v210_v1  ;;  %vm209_vm11 = vcmp.eq.f32.partialorder %v208_v3, 8.507059e+37 }
 0x2aa   :  { %v196_v60 = vpop.xlane.xlu1 %195 }
 0x2ab   :  { %v338_v61 = vpop.eup %337  ;;  %v198_v62 = vmax.f32 %v196_v60, 1e-12 }
 0x2ac   :  { %v200_v63 = vmul.f32 %v338_v61, %v197_v59  ;;  %vm205_vm8 = vweird.f32 %v338_v61 }
 0x2ad   :  { %339 = vrcp.f32 %v198_v62  ;;  %vm206_vm10 = vmor %vm204_vm9, %vm205_vm8  ;;  %v224_v12 = vand.u32 2147483648, %v198_v62  ;;  %v222_v14 = vand.u32 2147483647, %v198_v62  ;;  %vm218_vm13 = vweird.f32 %v198_v62 }
 0x2ae   :  { %v201_v0 = vsub.f32 1.0, %v200_v63 }
 0x2af   :  { %v225_v16 = vor.u32 1.1754944e-38, %v224_v12  ;;  %vm223_vm15 = vcmp.eq.f32.partialorder %v222_v14, 8.507059e+37 }
 0x2b0   :  { %v202_v2 = vmul.f32 %v338_v61, %v201_v0 }
 0x2b2   :  { %v203_v4 = vadd.f32 %v338_v61, %v202_v2 }
 0x2b3   :  { %v340_v5 = vpop.eup %339 }
 0x2b4   :  { %v214_v7 = vmul.f32 %v340_v5, %v198_v62  ;;  %v207_v8 = vsel %vm206_vm10, %v338_v61, %v203_v4  ;;  %vm219_vm12 = vweird.f32 %v340_v5 }
 0x2b5   :  { %v212_v9 = vsel %vm209_vm11, %v211_v6, %v207_v8  ;;  %vm220_vm14 = vmor %vm218_vm13, %vm219_vm12 }
 0x2b6   :  { %v215_v10 = vsub.f32 1.0, %v214_v7  ;;  %v227_v11 = vmul.f32 %v212_v9, %v187_v50 }
 0x2b8   :  { %325 = vmatmul.msk.f32.vlgmr.msrb.gmra.mxu1 %vm31_vm0, %v227_v11  ;;  %v216_v13 = vmul.f32 %v340_v5, %v215_v10 }
 0x2ba   :  { %v217_v15 = vadd.f32 %v340_v5, %v216_v13 }
 0x2bc   :  { %v221_v17 = vsel %vm220_vm14, %v340_v5, %v217_v15 }
 0x2bd   :  { %v226_v18 = vsel %vm223_vm15, %v225_v16, %v221_v17 }
 0x2be   :  { %v228_v19 = vmul.f32 %v226_v18, %v188_v55 }
 0x2c0   :  { %326 = vmatmul.msk.f32.gmra.mxu1 %vm31_vm0, %v228_v19 }
 0x335   :  { %v287_v21 = vpop.f32.mrf.mxu1 }
 0x336   :  { %v288_v22 = vadd.f32 %v332_v20, %v287_v21 }
 0x338   :  { %293 = vst.msk [vmem:[#allocation2] sm:$0xff] %vm31_vm0, %v288_v22 }
 0x33d   :  { %v290_v23 = vpop.f32.mrf.mxu1 }
 0x33e   :  { %v291_v24 = vadd.f32 %v332_v20, %v290_v23 }
 0x340   :  { %294 = vst.msk [vmem:[#allocation2 + $0x8] sm:$0xff] %vm31_vm0, %v291_v24 }
 0x341   :  { %307 = dma.vmem_to_hbm [thread:$0]  %s300_s10, 256, %s302_s13, [#allocation3], %s368_s14, %s368_s14, %s369_s15  }
 0x342   :  { %365 = dma.done.wait [#allocation3], 256  }
 0x343   :  { %366 = vsyncadd [#allocation3], 4294967040 }
 0x344   :  { %312 = vsyncpa [#allocation3], 1 }

</bundles_post_ra>
